<compile_context>
chip_gen: v7x
topology: tpu7x:2x2x1
jax: 0.10.0
libtpu: 0.0.40
codegen_flags: <defaults>
</compile_context>

<pallas_src>
import jax
import jax.numpy as jnp
from jax.experimental import pallas as pl
from jax.experimental.pallas import tpu as pltpu


def _round_up(n: int, m: int) -> int:
    return ((n + m - 1) // m) * m


# --------------------------------------------------------------------------
# Kernels
# --------------------------------------------------------------------------
def linout_kernel_fused(x_ref, w1_ref, b1_ref, w2_ref, b2_ref, o_ref):
    """One batch tile, full hidden in one shot (grid = (n_bt,))."""
    hid = jnp.dot(x_ref[...], w1_ref[...], preferred_element_type=jnp.float32)
    hid = jnp.maximum(hid + b1_ref[...], 0.0)          # Linear1 + ReLU
    # Dropout(p=0.2) -> identity in eval mode.
    out = jnp.dot(hid.astype(w2_ref.dtype), w2_ref[...],
                  preferred_element_type=jnp.float32)   # Linear2
    o_ref[...] = jax.nn.sigmoid(out + b2_ref[...]).astype(o_ref.dtype)


def linout_kernel_tiled(x_ref, w1_ref, b1_ref, w2_ref, b2_ref, o_ref):
    """Fallback when the full-hidden tile does not fit VMEM.

    grid = (n_bt, n_ht); accumulates partial Linear2 results directly into the
    resident output block (its block index is constant along h) -> no scratch.
    """
    h = pl.program_id(1)

    @pl.when(h == 0)
    def _init():
        o_ref[...] = jnp.zeros_like(o_ref)

    hid = jnp.dot(x_ref[...], w1_ref[...], preferred_element_type=jnp.float32)
    hid = jnp.maximum(hid + b1_ref[...], 0.0)           # Linear1 chunk + ReLU
    # Dropout(p=0.2) -> identity in eval mode.
    o_ref[...] += jnp.dot(hid.astype(w2_ref.dtype), w2_ref[...],
                          preferred_element_type=jnp.float32)

    @pl.when(h == pl.num_programs(1) - 1)
    def _finalize():
        o_ref[...] = jax.nn.sigmoid(o_ref[...] + b2_ref[...])


# --------------------------------------------------------------------------
# Tiling heuristics
# --------------------------------------------------------------------------
def _choose_batch_tiling(batch: int):
    b_pad = _round_up(max(batch, 8), 8)
    if b_pad > 256:
        tm = 256                       # 256-granularity MXU tiles (v6e/v7x)
        b_pad = _round_up(b_pad, tm)
    elif b_pad >= 16:
        tm = _round_up(b_pad // 2, 8)  # two batch tiles -> v7x megacore engages
        b_pad = 2 * tm
    else:
        tm = b_pad                     # single tiny tile
    return b_pad, tm


def _vmem_bytes_estimate(tm: int, in_pad: int, th: int, out_pad: int) -> int:
    bf16, f32 = 2, 4
    est = 2 * (tm * in_pad + in_pad * th + th * out_pad) * bf16  # double-buffered bf16 inputs
    est += 2 * (th + out_pad) * f32                              # biases (double-buffered)
    est += 2 * tm * out_pad * f32                                # f32 output block
    est += tm * th * f32                                         # f32 hid temporary
    return est


def _choose_hidden_tile(tm, in_pad, hid_pad, out_pad, budget_bytes):
    """Largest 128-multiple divisor of hid_pad whose tile set fits the budget."""
    n128 = hid_pad // 128
    candidates = sorted({d * 128 for d in range(1, n128 + 1) if n128 % d == 0},
                        reverse=True)
    for th in candidates:
        if _vmem_bytes_estimate(tm, in_pad, th, out_pad) <= budget_bytes:
            return th
    return 128


# --------------------------------------------------------------------------
# Parameter preparation (hoisted out of the per-call path)
# --------------------------------------------------------------------------
def prepare_linout_params(w1, b1, w2, b2):
    """Pad + cast weights once at model-load time.

    w1: (in_size, hidden), b1: (hidden,), w2: (hidden, out_size), b2: (out_size,).
    """
    in_size, hidden = w1.shape
    out_size = w2.shape[1]
    in_pad = _round_up(in_size, 128)
    hid_pad = _round_up(hidden, 128)
    out_pad = _round_up(out_size, 128)

    return dict(
        w1=jnp.pad(w1, ((0, in_pad - in_size), (0, hid_pad - hidden))).astype(jnp.bfloat16),
        b1=jnp.pad(b1, (0, hid_pad - hidden)).reshape(1, hid_pad).astype(jnp.float32),
        w2=jnp.pad(w2, ((0, hid_pad - hidden), (0, out_pad - out_size))).astype(jnp.bfloat16),
        b2=jnp.pad(b2, (0, out_pad - out_size)).reshape(1, out_pad).astype(jnp.float32),
        in_size=in_size, hidden=hidden, out_size=out_size,
    )


# --------------------------------------------------------------------------
# Forward
# --------------------------------------------------------------------------
def linout_forward(x_nchw, params, *, vmem_budget_bytes=40 << 20):
    """Linout forward. x_nchw: (B, C, H, W) f32. Returns (B, out_size) f32."""
    w1_p, b1_p, w2_p, b2_p = params["w1"], params["b1"], params["w2"], params["b2"]
    in_size, out_size = params["in_size"], params["out_size"]
    in_pad, hid_pad = w1_p.shape
    out_pad = w2_p.shape[1]

    B = x_nchw.shape[0]
    x2d = x_nchw.reshape(B, -1)                     # nn.Flatten (NCHW row-major)
    assert x2d.shape[1] == in_size, (x2d.shape, in_size)

    b_pad, tm = _choose_batch_tiling(B)
    th = _choose_hidden_tile(tm, in_pad, hid_pad, out_pad, vmem_budget_bytes)
    n_bt = b_pad // tm
    n_ht = hid_pad // th

    x_p = jnp.pad(x2d, ((0, b_pad - B), (0, in_pad - in_size))).astype(jnp.bfloat16)

    # Honest traffic estimate: with n_ht > 1 the W1/W2 block index resets every
    # batch tile, so weights are re-streamed n_bt times; with n_ht == 1 they are
    # resident and fetched exactly once.
    weight_bytes = (w1_p.size + w2_p.size) * 2
    cost = pl.CostEstimate(
        flops=2 * b_pad * (in_pad * hid_pad + hid_pad * out_pad),
        transcendentals=b_pad * out_pad,
        bytes_accessed=(x_p.size * 2
                        + (weight_bytes if n_ht == 1 else n_bt * weight_bytes)
                        + (b1_p.size + b2_p.size) * 4
                        + b_pad * out_pad * 4),
    )

    if n_ht == 1:
        kernel = linout_kernel_fused
        grid = (n_bt,)
        in_specs = [
            pl.BlockSpec((tm, in_pad), lambda i: (i, 0)),        # x batch tile
            pl.BlockSpec((in_pad, hid_pad), lambda i: (0, 0)),   # W1 resident
            pl.BlockSpec((1, hid_pad), lambda i: (0, 0)),        # b1 resident
            pl.BlockSpec((hid_pad, out_pad), lambda i: (0, 0)),  # W2 resident
            pl.BlockSpec((1, out_pad), lambda i: (0, 0)),        # b2 resident
        ]
        out_spec = pl.BlockSpec((tm, out_pad), lambda i: (i, 0))
        dims = ("parallel",)
    else:
        kernel = linout_kernel_tiled
        grid = (n_bt, n_ht)                                      # reduction axis last
        in_specs = [
            pl.BlockSpec((tm, in_pad), lambda i, h: (i, 0)),     # x batch tile
            pl.BlockSpec((in_pad, th), lambda i, h: (0, h)),     # W1 hidden chunk
            pl.BlockSpec((1, th), lambda i, h: (0, h)),          # b1 hidden chunk
            pl.BlockSpec((th, out_pad), lambda i, h: (h, 0)),    # W2 hidden chunk
            pl.BlockSpec((1, out_pad), lambda i, h: (0, 0)),     # b2 resident
        ]
        out_spec = pl.BlockSpec((tm, out_pad), lambda i, h: (i, 0))
        dims = ("parallel", "arbitrary")

    out_p = pl.pallas_call(
        kernel,
        out_shape=jax.ShapeDtypeStruct((b_pad, out_pad), jnp.float32),
        grid_spec=pltpu.PrefetchScalarGridSpec(
            num_scalar_prefetch=0,
            grid=grid,
            in_specs=in_specs,
            out_specs=out_spec,
        ),
        compiler_params=pltpu.CompilerParams(
            dimension_semantics=dims,
            vmem_limit_bytes=48 << 20,   # safe on v5e/v6e (128 MiB) and v7x (64 MiB)
        ),
        cost_estimate=cost,
    )(x_p, w1_p, b1_p, w2_p, b2_p)

    return out_p[:B, :out_size]


# --------------------------------------------------------------------------
# Self-test
# --------------------------------------------------------------------------
if __name__ == "__main__":
    # Small shapes consistent with the module's forward:
    # x: (batch=2, channels=4, spatial=16x16) -> in_size = 4*16*16 = 1024
    B, C, H, W = 2, 4, 16, 16
    in_size = C * H * W
    hidden = 200            # small stand-in for the module default 1000
    out_size = 8

    key = jax.random.PRNGKey(0)
    kx, kw1, kb1, kw2, kb2 = jax.random.split(key, 5)

    x = jax.random.normal(kx, (B, C, H, W), dtype=jnp.float32)

    # Deterministic parameter init (Kaiming-uniform-ish bounds like nn.Linear)
    bound1 = 1.0 / jnp.sqrt(jnp.float32(in_size))
    w1 = jax.random.uniform(kw1, (in_size, hidden), jnp.float32, -bound1, bound1)
    b1 = jax.random.uniform(kb1, (hidden,), jnp.float32, -bound1, bound1)
    bound2 = 1.0 / jnp.sqrt(jnp.float32(hidden))
    w2 = jax.random.uniform(kw2, (hidden, out_size), jnp.float32, -bound2, bound2)
    b2 = jax.random.uniform(kb2, (out_size,), jnp.float32, -bound2, bound2)

    params = prepare_linout_params(w1, b1, w2, b2)   # one-time pad + bf16 cast
    out = jax.block_until_ready(linout_forward(x, params))

    # f32 reference (kernel uses bf16 MXU inputs with f32 accumulation,
    # so tolerance is loosened vs. a pure-f32 path).
    x2d = x.reshape(B, -1)
    ref = jax.nn.sigmoid(jnp.maximum(x2d @ w1 + b1, 0.0) @ w2 + b2)
    assert out.shape == (B, out_size)
    assert jnp.allclose(out, ref, atol=2e-2, rtol=2e-2), (
        f"max abs err {jnp.max(jnp.abs(out - ref))}")

    print("KERNEL_OK")
</pallas_src>

<mosaic_0001>
module attributes {stable_mosaic.version = 11 : i64} {
  func.func @linout_kernel_fused(%arg0: i32, %arg1: memref<8x1024xbf16, #tpu.memory_space<vmem>>, %arg2: memref<1024x256xbf16, #tpu.memory_space<vmem>>, %arg3: memref<1x256xf32, #tpu.memory_space<vmem>>, %arg4: memref<256x128xbf16, #tpu.memory_space<vmem>>, %arg5: memref<1x128xf32, #tpu.memory_space<vmem>>, %arg6: memref<8x128xf32, #tpu.memory_space<vmem>>) attributes {dimension_semantics = [#tpu.dimension_semantics<parallel>], iteration_bounds = array<i64: 1>, scalar_prefetch = 0 : i64, scratch_operands = 0 : i64, tpu.core_type = #tpu.core_type<tc>, window_params = [{transform_indices = @transform_0, window_bounds = array<i64: 8, 1024>}, {pipeline_mode = #tpu.pipeline_mode<synchronous>, transform_indices = @transform_1, window_bounds = array<i64: 1024, 256>}, {pipeline_mode = #tpu.pipeline_mode<synchronous>, transform_indices = @transform_2, window_bounds = array<i64: 1, 256>}, {pipeline_mode = #tpu.pipeline_mode<synchronous>, transform_indices = @transform_3, window_bounds = array<i64: 256, 128>}, {pipeline_mode = #tpu.pipeline_mode<synchronous>, transform_indices = @transform_4, window_bounds = array<i64: 1, 128>}, {transform_indices = @transform_5, window_bounds = array<i64: 8, 128>}]} {
    %c0 = arith.constant 0 : index
    %c0_0 = arith.constant 0 : index
    %0 = vector.load %arg1[%c0, %c0_0] : memref<8x1024xbf16, #tpu.memory_space<vmem>>, vector<8x1024xbf16>
    %c0_1 = arith.constant 0 : index
    %c0_2 = arith.constant 0 : index
    %1 = vector.load %arg2[%c0_1, %c0_2] : memref<1024x256xbf16, #tpu.memory_space<vmem>>, vector<1024x256xbf16>
    %cst = arith.constant dense<0.000000e+00> : vector<8x256xf32>
    %2 = tpu.matmul %0, %1, %cst {dimension_numbers = #tpu.dot_dimension_numbers<[1], [0], [0], [1], [0, 0, 1, 1], [], []>} : vector<8x1024xbf16>, vector<1024x256xbf16>, vector<8x256xf32> -> vector<8x256xf32>
    %c0_3 = arith.constant 0 : index
    %c0_4 = arith.constant 0 : index
    %3 = vector.load %arg3[%c0_3, %c0_4] : memref<1x256xf32, #tpu.memory_space<vmem>>, vector<1x256xf32>
    %4 = vector.broadcast %3 : vector<1x256xf32> to vector<8x256xf32>
    %5 = arith.addf %2, %4 : vector<8x256xf32>
    %cst_5 = arith.constant 0.000000e+00 : f32
    %6 = vector.broadcast %cst_5 : f32 to vector<8x256xf32>
    %7 = arith.maximumf %5, %6 : vector<8x256xf32>
    %8 = arith.truncf %7 : vector<8x256xf32> to vector<8x256xbf16>
    %c0_6 = arith.constant 0 : index
    %c0_7 = arith.constant 0 : index
    %9 = vector.load %arg4[%c0_6, %c0_7] : memref<256x128xbf16, #tpu.memory_space<vmem>>, vector<256x128xbf16>
    %cst_8 = arith.constant dense<0.000000e+00> : vector<8x128xf32>
    %10 = tpu.matmul %8, %9, %cst_8 {dimension_numbers = #tpu.dot_dimension_numbers<[1], [0], [0], [1], [0, 0, 1, 1], [], []>} : vector<8x256xbf16>, vector<256x128xbf16>, vector<8x128xf32> -> vector<8x128xf32>
    %c0_9 = arith.constant 0 : index
    %c0_10 = arith.constant 0 : index
    %11 = vector.load %arg5[%c0_9, %c0_10] : memref<1x128xf32, #tpu.memory_space<vmem>>, vector<1x128xf32>
    %12 = vector.broadcast %11 : vector<1x128xf32> to vector<8x128xf32>
    %13 = arith.addf %10, %12 : vector<8x128xf32>
    %14 = arith.negf %13 : vector<8x128xf32>
    %15 = math.exp %14 : vector<8x128xf32>
    %cst_11 = arith.constant 1.000000e+00 : f32
    %16 = vector.broadcast %cst_11 : f32 to vector<8x128xf32>
    %17 = arith.addf %16, %15 : vector<8x128xf32>
    %18 = arith.divf %16, %17 : vector<8x128xf32>
    %c0_12 = arith.constant 0 : index
    %c0_13 = arith.constant 0 : index
    %19 = vector.load %arg6[%c0_12, %c0_13] : memref<8x128xf32, #tpu.memory_space<vmem>>, vector<8x128xf32>
    tpu.vector_store %arg6[%c0_12, %c0_13], %18 {strides = array<i32>} : memref<8x128xf32, #tpu.memory_space<vmem>>, vector<8x128xf32>,
    return
  }
  func.func @transform_0(%arg0: i32) -> (i32, i32) {
    %c0_i32 = arith.constant 0 : i32
    %c0_i32_0 = arith.constant 0 : i32
    return %arg0, %c0_i32 : i32, i32
  }
  func.func @transform_1(%arg0: i32) -> (i32, i32) {
    %c0_i32 = arith.constant 0 : i32
    %c0_i32_0 = arith.constant 0 : i32
    %c0_i32_1 = arith.constant 0 : i32
    return %c0_i32, %c0_i32_0 : i32, i32
  }
  func.func @transform_2(%arg0: i32) -> (i32, i32) {
    %c0_i32 = arith.constant 0 : i32
    %c0_i32_0 = arith.constant 0 : i32
    %c0_i32_1 = arith.constant 0 : i32
    return %c0_i32, %c0_i32_0 : i32, i32
  }
  func.func @transform_3(%arg0: i32) -> (i32, i32) {
    %c0_i32 = arith.constant 0 : i32
    %c0_i32_0 = arith.constant 0 : i32
    %c0_i32_1 = arith.constant 0 : i32
    return %c0_i32, %c0_i32_0 : i32, i32
  }
  func.func @transform_4(%arg0: i32) -> (i32, i32) {
    %c0_i32 = arith.constant 0 : i32
    %c0_i32_0 = arith.constant 0 : i32
    %c0_i32_1 = arith.constant 0 : i32
    return %c0_i32, %c0_i32_0 : i32, i32
  }
  func.func @transform_5(%arg0: i32) -> (i32, i32) {
    %c0_i32 = arith.constant 0 : i32
    %c0_i32_0 = arith.constant 0 : i32
    return %arg0, %c0_i32 : i32, i32
  }
}

</mosaic_0001>

<bundles_post_ra>
// kernel: tpu_custom_call.1
= control target key start
LH: loop header
LB: loop body
LE: loop exit
PB: predicated region body
PF: predicated region fallthrough
CT: control target
= control target key end

     0   :  { %10 = vsyncpa [#allocation3], 0  ;;  %s1853_s0 = inlined_call_operand.hbm [shape: bf16[8,1024], index: 0, kind: input, shape index: {}]   ;;  %s1854_s1 = inlined_call_operand.hbm [shape: bf16[1024,256], index: 1, kind: input, shape index: {}]   ;;  %s1855_s2 = inlined_call_operand.vmem [shape: f32[1,256], index: 2, kind: input, shape index: {}]   ;;  %s1856_s3 = inlined_call_operand.hbm [shape: bf16[256,128], index: 3, kind: input, shape index: {}]   ;;  %s1857_s4 = inlined_call_operand.vmem [shape: f32[1,128], index: 4, kind: input, shape index: {}]   ;;  %s1858_s5 = inlined_call_operand.hbm [shape: f32[8,128], index: 5, kind: output, shape index: {}]  }
   0x1   :  { %11 = vsyncpa [#allocation6], 0 }
   0x2   :  { %12 = vsyncpa [#allocation4], 0  ;;  %s1749_s18 = smov [#allocation5]   ;;  %s1655_s22 = scalar_lea.hbm %s1854_s1, 16384 }
   0x3   :  { %s28_s19 = sshll.u32 %s1749_s18, 4  ;;  %p1656_p0 = scmp.ne.s32.totalorder %s1854_s1, %s1655_s22  ;;  %s29_s19 = int_to_ptr.vmem [resolvable:$true] %s28_s19 }
   0x4   :  { %p1659_p1 = scmp.lt.u32.totalorder %s1655_s22, %s1854_s1 }
   0x6   :  { %p1661_p2 = pnand %p1659_p1, %p1656_p0 }
   0x8   :  { %1664 = shalt.err (!%p1661_p2)
}
   0x9   :  { %s1665_s27 = scalar_lea.vmem %s29_s19, 16384  ;;  %p1670_p4 = scmp.lt.s32.totalorder %s29_s19, %s29_s19 }
   0xa   :  { %p1666_p3 = scmp.ne.s32.totalorder %s29_s19, %s1665_s27  ;;  %p1671_p5 = scmp.lt.s32.totalorder %s1665_s27, %s1665_s27 }
   0xc   :  { %p1672_p6 = por %p1671_p5, %p1670_p4 }
   0xe   :  { %p1673_p7 = pnand %p1672_p6, %p1666_p3 }
  0x10   :  { %1676 = shalt.err (!%p1673_p7)
}
  0x11   :  { %s1750_s28 = smov 128   ;;  %s1751_s29 = smov 8  }
  0x12   :  { %34 = dma.hbm_to_vmem [thread:$0]  %s1854_s1, 16384, %s29_s19, [#allocation6], %s1750_s28, %s1750_s28, %s1751_s29  }
  0x13   :  { %s1752_s7 = smov [#allocation2]   ;;  %s1753_s9 = smov [#allocation7]  }
  0x14   :  { %s19_s8 = sshll.u32 %s1752_s7, 4  ;;  %s42_s10 = sshll.u32 %s1753_s9, 4  ;;  %s20_s8 = int_to_ptr.vmem [resolvable:$true] %s19_s8  ;;  %s43_s10 = int_to_ptr.vmem [resolvable:$true] %s42_s10 }
  0x15   :  { %s1677_s13 = scalar_lea.hbm %s1853_s0, 512 }
  0x16   :  { %p1678_p8 = scmp.ne.s32.totalorder %s1853_s0, %s1677_s13  ;;  %p1681_p9 = scmp.lt.u32.totalorder %s1677_s13, %s1853_s0 }
  0x18   :  { %p1683_p10 = pnand %p1681_p9, %p1678_p8 }
  0x1a   :  { %1686 = shalt.err (!%p1683_p10)
}
  0x1b   :  { %s1687_s1 = scalar_lea.vmem %s20_s8, 512  ;;  %p1692_p12 = scmp.lt.s32.totalorder %s20_s8, %s20_s8 }
  0x1c   :  { %p1688_p11 = scmp.ne.s32.totalorder %s20_s8, %s1687_s1  ;;  %p1693_p13 = scmp.lt.s32.totalorder %s1687_s1, %s1687_s1 }
  0x1e   :  { %p1694_p0 = por %p1693_p13, %p1692_p12 }
  0x20   :  { %p1695_p1 = pnand %p1694_p0, %p1688_p11 }
  0x22   :  { %1698 = shalt.err (!%p1695_p1)
}
  0x23   :  { %22 = dma.hbm_to_vmem [thread:$0]  %s1853_s0, 512, %s20_s8, [#allocation3]  }
  0x24   :  { %s1699_s22 = scalar_lea.hbm %s1856_s3, 2048 }
  0x25   :  { %p1700_p2 = scmp.ne.s32.totalorder %s1856_s3, %s1699_s22  ;;  %p1703_p3 = scmp.lt.u32.totalorder %s1699_s22, %s1856_s3 }
  0x27   :  { %p1705_p4 = pnand %p1703_p3, %p1700_p2 }
  0x29   :  { %1708 = shalt.err (!%p1705_p4)
}
  0x2a   :  { %s1709_s27 = scalar_lea.vmem %s43_s10, 2048  ;;  %p1714_p6 = scmp.lt.s32.totalorder %s43_s10, %s43_s10 }
  0x2b   :  { %p1710_p5 = scmp.ne.s32.totalorder %s43_s10, %s1709_s27  ;;  %p1715_p7 = scmp.lt.s32.totalorder %s1709_s27, %s1709_s27 }
  0x2d   :  { %p1716_p8 = por %p1715_p7, %p1714_p6 }
  0x2f   :  { %p1717_p9 = pnand %p1716_p8, %p1710_p5 }
  0x31   :  { %1720 = shalt.err (!%p1717_p9)
}
  0x32   :  { %s1754_s0 = smov 64   ;;  %s1755_s28 = smov 4  }
  0x33   :  { %48 = dma.hbm_to_vmem [thread:$0]  %s1856_s3, 2048, %s43_s10, [#allocation6], %s1754_s0, %s1754_s0, %s1755_s28  }
  0x34   :  { %1743 = dma.done.wait [#allocation3], 512  }
  0x35   :  { %1744 = vsyncadd [#allocation3], 4294966784 }
  0x36   :  { %1745 = dma.done.wait [#allocation6], 18432  }
  0x37   :  { %1746 = vsyncadd [#allocation6], 4294948864  ;;  %v1435_v0 = vld [vmem:[#allocation5 + $0x4] ss:$8 sps:$4 sm:$0xff]   ;;  %v1439_v2 = vld [vmem:[#allocation5] ss:$8 sps:$4 sm:$0xff]  }
  0x38   :  { %v1437_v1 = vld [vmem:[#allocation5 + $0x204] ss:$8 sps:$4 sm:$0xff]   ;;  %873 = vmatprep.subr.bf16.mxu1 %v1435_v0  ;;  %v1440_v3 = vld [vmem:[#allocation5 + $0x200] ss:$8 sps:$4 sm:$0xff]   ;;  %v1441_v4 = vld [vmem:[#allocation5 + $0x14] ss:$8 sps:$4 sm:$0xff]  }
  0x39   :  { %955 = vmatprep.subr.bf16.mxu0 %v1437_v1  ;;  %874 = vmatpush1.bf16.msra.mxu1 %v1439_v2  ;;  %v1443_v5 = vld [vmem:[#allocation5 + $0x214] ss:$8 sps:$4 sm:$0xff]   ;;  %v1445_v6 = vld [vmem:[#allocation5 + $0x10] ss:$8 sps:$4 sm:$0xff]   ;;  %v1447_v8 = vld [vmem:[#allocation5 + $0x24] ss:$8 sps:$4 sm:$0xff]  }
  0x3a   :  { %956 = vmatpush1.bf16.msra.mxu0 %v1440_v3  ;;  %875 = vmatprep.subr.bf16.mxu1 %v1441_v4  ;;  %v1446_v7 = vld [vmem:[#allocation5 + $0x210] ss:$8 sps:$4 sm:$0xff]   ;;  %v1449_v9 = vld [vmem:[#allocation5 + $0x224] ss:$8 sps:$4 sm:$0xff]   ;;  %v1451_v10 = vld [vmem:[#allocation5 + $0x20] ss:$8 sps:$4 sm:$0xff]  }
  0x3b   :  { %957 = vmatprep.subr.bf16.mxu0 %v1443_v5  ;;  %v1452_v11 = vld [vmem:[#allocation5 + $0x220] ss:$8 sps:$4 sm:$0xff]   ;;  %v1453_v12 = vld [vmem:[#allocation5 + $0x34] ss:$8 sps:$4 sm:$0xff]   ;;  %v1457_v14 = vld [vmem:[#allocation5 + $0x30] ss:$8 sps:$4 sm:$0xff]  }
  0x3c   :  { %v1455_v13 = vld [vmem:[#allocation5 + $0x234] ss:$8 sps:$4 sm:$0xff]   ;;  %v1458_v15 = vld [vmem:[#allocation5 + $0x230] ss:$8 sps:$4 sm:$0xff]   ;;  %v1459_v16 = vld [vmem:[#allocation5 + $0x44] ss:$8 sps:$4 sm:$0xff]  }
  0x3d   :  { %876 = vmatpush1.bf16.msra.mxu1 %v1445_v6  ;;  %v1461_v17 = vld [vmem:[#allocation5 + $0x244] ss:$8 sps:$4 sm:$0xff]   ;;  %v1463_v18 = vld [vmem:[#allocation5 + $0x40] ss:$8 sps:$4 sm:$0xff]   ;;  %v1465_v20 = vld [vmem:[#allocation5 + $0x54] ss:$8 sps:$4 sm:$0xff]  }
  0x3e   :  { %958 = vmatpush1.bf16.msra.mxu0 %v1446_v7  ;;  %877 = vmatprep.subr.bf16.mxu1 %v1447_v8  ;;  %v1464_v19 = vld [vmem:[#allocation5 + $0x240] ss:$8 sps:$4 sm:$0xff]   ;;  %v1467_v21 = vld [vmem:[#allocation5 + $0x254] ss:$8 sps:$4 sm:$0xff]   ;;  %v1469_v22 = vld [vmem:[#allocation5 + $0x50] ss:$8 sps:$4 sm:$0xff]  }
  0x3f   :  { %959 = vmatprep.subr.bf16.mxu0 %v1449_v9  ;;  %v1470_v23 = vld [vmem:[#allocation5 + $0x250] ss:$8 sps:$4 sm:$0xff]   ;;  %v1471_v24 = vld [vmem:[#allocation5 + $0x64] ss:$8 sps:$4 sm:$0xff]   ;;  %v1475_v26 = vld [vmem:[#allocation5 + $0x60] ss:$8 sps:$4 sm:$0xff]  }
  0x40   :  { %v1473_v25 = vld [vmem:[#allocation5 + $0x264] ss:$8 sps:$4 sm:$0xff]   ;;  %v1476_v27 = vld [vmem:[#allocation5 + $0x260] ss:$8 sps:$4 sm:$0xff]   ;;  %v1477_v28 = vld [vmem:[#allocation5 + $0x74] ss:$8 sps:$4 sm:$0xff]  }
  0x41   :  { %878 = vmatpush1.bf16.msra.mxu1 %v1451_v10  ;;  %v1479_v29 = vld [vmem:[#allocation5 + $0x274] ss:$8 sps:$4 sm:$0xff]   ;;  %v1481_v30 = vld [vmem:[#allocation5 + $0x70] ss:$8 sps:$4 sm:$0xff]   ;;  %v1483_v32 = vld [vmem:[#allocation5 + $0x84] ss:$8 sps:$4 sm:$0xff]  }
  0x42   :  { %960 = vmatpush1.bf16.msra.mxu0 %v1452_v11  ;;  %879 = vmatprep.subr.bf16.mxu1 %v1453_v12  ;;  %v1482_v31 = vld [vmem:[#allocation5 + $0x270] ss:$8 sps:$4 sm:$0xff]   ;;  %v1485_v33 = vld [vmem:[#allocation5 + $0x284] ss:$8 sps:$4 sm:$0xff]   ;;  %v1487_v34 = vld [vmem:[#allocation5 + $0x80] ss:$8 sps:$4 sm:$0xff]  }
  0x43   :  { %961 = vmatprep.subr.bf16.mxu0 %v1455_v13  ;;  %v1488_v35 = vld [vmem:[#allocation5 + $0x280] ss:$8 sps:$4 sm:$0xff]   ;;  %v1489_v36 = vld [vmem:[#allocation5 + $0x94] ss:$8 sps:$4 sm:$0xff]   ;;  %v1493_v38 = vld [vmem:[#allocation5 + $0x90] ss:$8 sps:$4 sm:$0xff]  }
  0x44   :  { %v1491_v37 = vld [vmem:[#allocation5 + $0x294] ss:$8 sps:$4 sm:$0xff]   ;;  %v1494_v39 = vld [vmem:[#allocation5 + $0x290] ss:$8 sps:$4 sm:$0xff]   ;;  %v1495_v40 = vld [vmem:[#allocation5 + $0xa4] ss:$8 sps:$4 sm:$0xff]  }
  0x45   :  { %880 = vmatpush1.bf16.msra.mxu1 %v1457_v14  ;;  %v1497_v41 = vld [vmem:[#allocation5 + $0x2a4] ss:$8 sps:$4 sm:$0xff]   ;;  %v1499_v42 = vld [vmem:[#allocation5 + $0xa0] ss:$8 sps:$4 sm:$0xff]   ;;  %v1501_v44 = vld [vmem:[#allocation5 + $0xb4] ss:$8 sps:$4 sm:$0xff]  }
  0x46   :  { %962 = vmatpush1.bf16.msra.mxu0 %v1458_v15  ;;  %881 = vmatprep.subr.bf16.mxu1 %v1459_v16  ;;  %v1500_v43 = vld [vmem:[#allocation5 + $0x2a0] ss:$8 sps:$4 sm:$0xff]   ;;  %v1503_v45 = vld [vmem:[#allocation5 + $0x2b4] ss:$8 sps:$4 sm:$0xff]   ;;  %v1505_v47 = vld [vmem:[#allocation5 + $0xb0] ss:$8 sps:$4 sm:$0xff]  }
  0x47   :  { %963 = vmatprep.subr.bf16.mxu0 %v1461_v17  ;;  %v61_v46 = vld [vmem:[#allocation2] sm:$0xff]  ;;  %v1506_v49 = vld [vmem:[#allocation5 + $0x2b0] ss:$8 sps:$4 sm:$0xff]   ;;  %v1513_v56 = vld [vmem:[#allocation5 + $0xd4] ss:$8 sps:$4 sm:$0xff]   ;;  %s1756_s8 = smov [#allocation8]  }
  0x48   :  { %v1240_v48 = vcombine.high %v61_v46, %v61_v46  ;;  %v63_v50 = vld [vmem:[#allocation2 + $0x10] sm:$0xff]  ;;  %v1507_v51 = vld [vmem:[#allocation5 + $0xc4] ss:$8 sps:$4 sm:$0xff]   ;;  %v1511_v54 = vld [vmem:[#allocation5 + $0xc0] ss:$8 sps:$4 sm:$0xff]   ;;  %v1239_v6 = vcombine.low %v61_v46, %v61_v46  ;;  %s1229_s9 = sshll.u32 %s1756_s8, 4  ;;  %s1230_s9 = int_to_ptr.vmem [resolvable:$true] %s1229_s9 }
  0x49   :  { %882 = vmatpush1.bf16.msra.mxu1 %v1463_v18  ;;  %v1509_v52 = vld [vmem:[#allocation5 + $0x2c4] ss:$8 sps:$4 sm:$0xff]   ;;  %v1244_v53 = vcombine.high %v63_v50, %v63_v50  ;;  %v1512_v55 = vld [vmem:[#allocation5 + $0x2c0] ss:$8 sps:$4 sm:$0xff]   ;;  %v1515_v57 = vld [vmem:[#allocation5 + $0x2d4] ss:$8 sps:$4 sm:$0xff]   ;;  %v1243_v7 = vcombine.low %v63_v50, %v63_v50  ;;  %p1726_p11 = scmp.lt.s32.totalorder %s1230_s9, %s1230_s9 }
  0x4a   :  { %964 = vmatpush1.bf16.msra.mxu0 %v1464_v19  ;;  %883 = vmatprep.subr.bf16.mxu1 %v1465_v20  ;;  %v1517_v58 = vld [vmem:[#allocation5 + $0xd0] ss:$8 sps:$4 sm:$0xff]   ;;  %v1519_v60 = vld [vmem:[#allocation5 + $0xe4] ss:$8 sps:$4 sm:$0xff]   ;;  %v1523_v62 = vld [vmem:[#allocation5 + $0xe0] ss:$8 sps:$4 sm:$0xff]  }
  0x4b   :  { %965 = vmatprep.subr.bf16.mxu0 %v1467_v21  ;;  %905 = vmatprep.mubr.bf16.mxu1 %v1240_v48  ;;  %v1518_v59 = vld [vmem:[#allocation5 + $0x2d0] ss:$8 sps:$4 sm:$0xff]   ;;  %v1521_v61 = vld [vmem:[#allocation5 + $0x2e4] ss:$8 sps:$4 sm:$0xff]   ;;  %v1524_v63 = vld [vmem:[#allocation5 + $0x2e0] ss:$8 sps:$4 sm:$0xff]  }
  0x4c   :  { %987 = vmatprep.mubr.bf16.mxu0 %v1244_v53  ;;  %v1525_v0 = vld [vmem:[#allocation5 + $0xf4] ss:$8 sps:$4 sm:$0xff]   ;;  %v1529_v2 = vld [vmem:[#allocation5 + $0xf0] ss:$8 sps:$4 sm:$0xff]   ;;  %v1535_v4 = vld [vmem:[#allocation5 + $0x104] ss:$8 sps:$4 sm:$0xff]  }
  0x4d   :  { %884 = vmatpush1.bf16.msra.mxu1 %v1469_v22  ;;  %v1527_v1 = vld [vmem:[#allocation5 + $0x2f4] ss:$8 sps:$4 sm:$0xff]   ;;  %v1530_v3 = vld [vmem:[#allocation5 + $0x2f0] ss:$8 sps:$4 sm:$0xff]   ;;  %v1540_v5 = vld [vmem:[#allocation5 + $0x304] ss:$8 sps:$4 sm:$0xff]  }
  0x4e   :  { %966 = vmatpush1.bf16.msra.mxu0 %v1470_v23  ;;  %885 = vmatprep.subr.bf16.mxu1 %v1471_v24  ;;  %v1533_v8 = vld [vmem:[#allocation5 + $0x100] ss:$8 sps:$4 sm:$0xff]   ;;  %v1543_v10 = vld [vmem:[#allocation5 + $0x114] ss:$8 sps:$4 sm:$0xff]   ;;  %v1541_v12 = vld [vmem:[#allocation5 + $0x110] ss:$8 sps:$4 sm:$0xff]  }
  0x4f   :  { %967 = vmatprep.subr.bf16.mxu0 %v1473_v25  ;;  %v1538_v9 = vld [vmem:[#allocation5 + $0x300] ss:$8 sps:$4 sm:$0xff]   ;;  %v1546_v11 = vld [vmem:[#allocation5 + $0x314] ss:$8 sps:$4 sm:$0xff]   ;;  %v1544_v13 = vld [vmem:[#allocation5 + $0x310] ss:$8 sps:$4 sm:$0xff]  }
  0x50   :  { %v1549_v14 = vld [vmem:[#allocation5 + $0x124] ss:$8 sps:$4 sm:$0xff]   ;;  %v1547_v16 = vld [vmem:[#allocation5 + $0x120] ss:$8 sps:$4 sm:$0xff]   ;;  %v1555_v18 = vld [vmem:[#allocation5 + $0x134] ss:$8 sps:$4 sm:$0xff]  }
  0x51   :  { %886 = vmatpush1.bf16.msra.mxu1 %v1475_v26  ;;  %v1552_v15 = vld [vmem:[#allocation5 + $0x324] ss:$8 sps:$4 sm:$0xff]   ;;  %v1550_v17 = vld [vmem:[#allocation5 + $0x320] ss:$8 sps:$4 sm:$0xff]   ;;  %v1558_v19 = vld [vmem:[#allocation5 + $0x334] ss:$8 sps:$4 sm:$0xff]  }
  0x52   :  { %968 = vmatpush1.bf16.msra.mxu0 %v1476_v27  ;;  %887 = vmatprep.subr.bf16.mxu1 %v1477_v28  ;;  %v1553_v20 = vld [vmem:[#allocation5 + $0x130] ss:$8 sps:$4 sm:$0xff]   ;;  %v1561_v22 = vld [vmem:[#allocation5 + $0x144] ss:$8 sps:$4 sm:$0xff]   ;;  %v1559_v24 = vld [vmem:[#allocation5 + $0x140] ss:$8 sps:$4 sm:$0xff]  }
  0x53   :  { %969 = vmatprep.subr.bf16.mxu0 %v1479_v29  ;;  %v1556_v21 = vld [vmem:[#allocation5 + $0x330] ss:$8 sps:$4 sm:$0xff]   ;;  %v1564_v23 = vld [vmem:[#allocation5 + $0x344] ss:$8 sps:$4 sm:$0xff]   ;;  %v1562_v25 = vld [vmem:[#allocation5 + $0x340] ss:$8 sps:$4 sm:$0xff]  }
  0x54   :  { %v1567_v26 = vld [vmem:[#allocation5 + $0x154] ss:$8 sps:$4 sm:$0xff]   ;;  %v1565_v28 = vld [vmem:[#allocation5 + $0x150] ss:$8 sps:$4 sm:$0xff]   ;;  %v1597_v50 = vld [vmem:[#allocation5 + $0x1a4] ss:$8 sps:$4 sm:$0xff]  }
  0x55   :  { %888 = vmatpush1.bf16.msra.mxu1 %v1481_v30  ;;  %v1570_v27 = vld [vmem:[#allocation5 + $0x354] ss:$8 sps:$4 sm:$0xff]   ;;  %v1568_v29 = vld [vmem:[#allocation5 + $0x350] ss:$8 sps:$4 sm:$0xff]   ;;  %v1573_v30 = vld [vmem:[#allocation5 + $0x164] ss:$8 sps:$4 sm:$0xff]  }
  0x56   :  { %970 = vmatpush1.bf16.msra.mxu0 %v1482_v31  ;;  %889 = vmatprep.subr.bf16.mxu1 %v1483_v32  ;;  %v1576_v31 = vld [vmem:[#allocation5 + $0x364] ss:$8 sps:$4 sm:$0xff]   ;;  %v1571_v32 = vld [vmem:[#allocation5 + $0x160] ss:$8 sps:$4 sm:$0xff]   ;;  %v1591_v46 = vld [vmem:[#allocation5 + $0x194] ss:$8 sps:$4 sm:$0xff]  }
  0x57   :  { %971 = vmatprep.subr.bf16.mxu0 %v1485_v33  ;;  %v1823_v33 = vld [vmem:[#allocation2 + $0x8] sm:$0xff]  ;;  %v1589_v48 = vld [vmem:[#allocation5 + $0x190] ss:$8 sps:$4 sm:$0xff]   ;;  %s1721_s10 = scalar_lea.vmem %s1230_s9, 128 }
  0x58   :  { %v1598_v53 = vld [vmem:[#allocation5 + $0x3a0] ss:$8 sps:$4 sm:$0xff]   ;;  %p1722_p10 = scmp.ne.s32.totalorder %s1230_s9, %s1721_s10  ;;  %p1727_p12 = scmp.lt.s32.totalorder %s1721_s10, %s1721_s10 }
  0x59   :  { %890 = vmatpush1.bf16.msra.mxu1 %v1487_v34  ;;  %v1825_v34 = vld [vmem:[#allocation2 + $0x18] sm:$0xff] }
  0x5a   :  { %972 = vmatpush1.bf16.msra.mxu0 %v1488_v35  ;;  %891 = vmatprep.subr.bf16.mxu1 %v1489_v36  ;;  %v1574_v35 = vld [vmem:[#allocation5 + $0x360] ss:$8 sps:$4 sm:$0xff]   ;;  %v1242_v36 = vcombine.high %v1823_v33, %v1823_v33  ;;  %p1728_p13 = por %p1727_p12, %p1726_p11 }
  0x5b   :  { %973 = vmatprep.subr.bf16.mxu0 %v1491_v37  ;;  %v1246_v37 = vcombine.high %v1825_v34, %v1825_v34 }
  0x5c   :  { %p1729_p0 = pnand %p1728_p13, %p1722_p10 }
  0x5d   :  { %892 = vmatpush1.bf16.msra.mxu1 %v1493_v38  ;;  %v1579_v38 = vld [vmem:[#allocation5 + $0x174] ss:$8 sps:$4 sm:$0xff]  }
  0x5e   :  { %974 = vmatpush1.bf16.msra.mxu0 %v1494_v39  ;;  %893 = vmatprep.subr.bf16.mxu1 %v1495_v40  ;;  %v1582_v39 = vld [vmem:[#allocation5 + $0x374] ss:$8 sps:$4 sm:$0xff]   ;;  %v1577_v40 = vld [vmem:[#allocation5 + $0x170] ss:$8 sps:$4 sm:$0xff]  }
  0x5f   :  { %975 = vmatprep.subr.bf16.mxu0 %v1497_v41  ;;  %v1580_v41 = vld [vmem:[#allocation5 + $0x370] ss:$8 sps:$4 sm:$0xff]  }
  0x61   :  { %894 = vmatpush1.bf16.msra.mxu1 %v1499_v42  ;;  %v1585_v42 = vld [vmem:[#allocation5 + $0x184] ss:$8 sps:$4 sm:$0xff]  }
  0x62   :  { %976 = vmatpush1.bf16.msra.mxu0 %v1500_v43  ;;  %895 = vmatprep.subr.bf16.mxu1 %v1501_v44  ;;  %v1588_v43 = vld [vmem:[#allocation5 + $0x384] ss:$8 sps:$4 sm:$0xff]   ;;  %v1583_v44 = vld [vmem:[#allocation5 + $0x180] ss:$8 sps:$4 sm:$0xff]  }
  0x63   :  { %977 = vmatprep.subr.bf16.mxu0 %v1503_v45  ;;  %v1586_v45 = vld [vmem:[#allocation5 + $0x380] ss:$8 sps:$4 sm:$0xff]  }
  0x65   :  { %896 = vmatpush1.bf16.msra.mxu1 %v1505_v47  ;;  %v1594_v47 = vld [vmem:[#allocation5 + $0x394] ss:$8 sps:$4 sm:$0xff]  }
  0x66   :  { %978 = vmatpush1.bf16.msra.mxu0 %v1506_v49  ;;  %897 = vmatprep.subr.bf16.mxu1 %v1507_v51  ;;  %v1592_v49 = vld [vmem:[#allocation5 + $0x390] ss:$8 sps:$4 sm:$0xff]   ;;  %v1600_v51 = vld [vmem:[#allocation5 + $0x3a4] ss:$8 sps:$4 sm:$0xff]  }
  0x67   :  { %979 = vmatprep.subr.bf16.mxu0 %v1509_v52  ;;  %v1595_v52 = vld [vmem:[#allocation5 + $0x1a0] ss:$8 sps:$4 sm:$0xff]  }
  0x69   :  { %898 = vmatpush1.bf16.msra.mxu1 %v1511_v54  ;;  %v1603_v54 = vld [vmem:[#allocation5 + $0x1b4] ss:$8 sps:$4 sm:$0xff]  }
  0x6a   :  { %980 = vmatpush1.bf16.msra.mxu0 %v1512_v55  ;;  %899 = vmatprep.subr.bf16.mxu1 %v1513_v56  ;;  %v1606_v55 = vld [vmem:[#allocation5 + $0x3b4] ss:$8 sps:$4 sm:$0xff]   ;;  %v1601_v56 = vld [vmem:[#allocation5 + $0x1b0] ss:$8 sps:$4 sm:$0xff]  }
  0x6b   :  { %981 = vmatprep.subr.bf16.mxu0 %v1515_v57  ;;  %v1604_v57 = vld [vmem:[#allocation5 + $0x3b0] ss:$8 sps:$4 sm:$0xff]  }
  0x6d   :  { %900 = vmatpush1.bf16.msra.mxu1 %v1517_v58  ;;  %v1609_v58 = vld [vmem:[#allocation5 + $0x1c4] ss:$8 sps:$4 sm:$0xff]  }
  0x6e   :  { %982 = vmatpush1.bf16.msra.mxu0 %v1518_v59  ;;  %901 = vmatprep.subr.bf16.mxu1 %v1519_v60  ;;  %v1612_v59 = vld [vmem:[#allocation5 + $0x3c4] ss:$8 sps:$4 sm:$0xff]   ;;  %v1607_v60 = vld [vmem:[#allocation5 + $0x1c0] ss:$8 sps:$4 sm:$0xff]  }
  0x6f   :  { %983 = vmatprep.subr.bf16.mxu0 %v1521_v61  ;;  %v1610_v61 = vld [vmem:[#allocation5 + $0x3c0] ss:$8 sps:$4 sm:$0xff]  }
  0x71   :  { %902 = vmatpush1.bf16.msra.mxu1 %v1523_v62  ;;  %v1615_v62 = vld [vmem:[#allocation5 + $0x1d4] ss:$8 sps:$4 sm:$0xff]  }
  0x72   :  { %984 = vmatpush1.bf16.msra.mxu0 %v1524_v63  ;;  %903 = vmatprep.subr.bf16.mxu1 %v1525_v0  ;;  %v1618_v63 = vld [vmem:[#allocation5 + $0x3d4] ss:$8 sps:$4 sm:$0xff]   ;;  %v1613_v0 = vld [vmem:[#allocation5 + $0x1d0] ss:$8 sps:$4 sm:$0xff]  }
  0x73   :  { %985 = vmatprep.subr.bf16.mxu0 %v1527_v1  ;;  %v1616_v1 = vld [vmem:[#allocation5 + $0x3d0] ss:$8 sps:$4 sm:$0xff]  }
  0x75   :  { %904 = vmatpush1.bf16.msra.mxu1 %v1529_v2  ;;  %v1621_v2 = vld [vmem:[#allocation5 + $0x1e4] ss:$8 sps:$4 sm:$0xff]  }
  0x76   :  { %986 = vmatpush1.bf16.msra.mxu0 %v1530_v3  ;;  %914 = vmatprep.subr.bf16.mxu1 %v1535_v4  ;;  %v1624_v3 = vld [vmem:[#allocation5 + $0x3e4] ss:$8 sps:$4 sm:$0xff]   ;;  %v1619_v4 = vld [vmem:[#allocation5 + $0x1e0] ss:$8 sps:$4 sm:$0xff]  }
  0x77   :  { %996 = vmatprep.subr.bf16.mxu0 %v1540_v5  ;;  %v1622_v5 = vld [vmem:[#allocation5 + $0x3e0] ss:$8 sps:$4 sm:$0xff]  }
  0x78   :  { %906 = vmatmul.mubr.bf16.vlgmr.msra.gmra.mrb[0].mxu1 %v1239_v6  ;;  %v1627_v6 = vld [vmem:[#allocation5 + $0x1f4] ss:$8 sps:$4 sm:$0xff]  }
  0x79   :  { %988 = vmatmul.mubr.bf16.vlgmr.msra.gmra.mrb[0].mxu0 %v1243_v7  ;;  %915 = vmatpush1.bf16.msra.mxu1 %v1533_v8  ;;  %v1630_v7 = vld [vmem:[#allocation5 + $0x3f4] ss:$8 sps:$4 sm:$0xff]   ;;  %v1625_v8 = vld [vmem:[#allocation5 + $0x1f0] ss:$8 sps:$4 sm:$0xff]  }
  0x7a   :  { %997 = vmatpush1.bf16.msra.mxu0 %v1538_v9  ;;  %916 = vmatprep.subr.bf16.mxu1 %v1543_v10  ;;  %v1628_v9 = vld [vmem:[#allocation5 + $0x3f0] ss:$8 sps:$4 sm:$0xff]   ;;  %v1635_v10 = vld [vmem:[#allocation7 + $0x40] sm:$0xff]  }
  0x7b   :  { %998 = vmatprep.subr.bf16.mxu0 %v1546_v11  ;;  %946 = vmatprep.mubr.bf16.mxu1 %v1242_v36  ;;  %v1241_v11 = vcombine.low %v1823_v33, %v1823_v33 }
  0x7c   :  { %1028 = vmatprep.mubr.bf16.mxu0 %v1246_v37 }
  0x7d   :  { %917 = vmatpush1.bf16.msra.mxu1 %v1541_v12  ;;  %v1245_v12 = vcombine.low %v1825_v34, %v1825_v34 }
  0x7e   :  { %999 = vmatpush1.bf16.msra.mxu0 %v1544_v13  ;;  %918 = vmatprep.subr.bf16.mxu1 %v1549_v14  ;;  %v1636_v13 = vld [vmem:[#allocation7] sm:$0xff]   ;;  %v1637_v14 = vld [vmem:[#allocation7 + $0x48] sm:$0xff]  }
  0x7f   :  { %1000 = vmatprep.subr.bf16.mxu0 %v1552_v15  ;;  %v1638_v15 = vld [vmem:[#allocation7 + $0x8] sm:$0xff]  }
  0x81   :  { %919 = vmatpush1.bf16.msra.mxu1 %v1547_v16  ;;  %v1639_v16 = vld [vmem:[#allocation7 + $0x50] sm:$0xff]  }
  0x82   :  { %1001 = vmatpush1.bf16.msra.mxu0 %v1550_v17  ;;  %920 = vmatprep.subr.bf16.mxu1 %v1555_v18  ;;  %v1640_v17 = vld [vmem:[#allocation7 + $0x10] sm:$0xff]   ;;  %v1641_v18 = vld [vmem:[#allocation7 + $0x58] sm:$0xff]  }
  0x83   :  { %1002 = vmatprep.subr.bf16.mxu0 %v1558_v19  ;;  %v1642_v19 = vld [vmem:[#allocation7 + $0x18] sm:$0xff]  }
  0x85   :  { %921 = vmatpush1.bf16.msra.mxu1 %v1553_v20  ;;  %v1643_v20 = vld [vmem:[#allocation7 + $0x60] sm:$0xff]  }
  0x86   :  { %1003 = vmatpush1.bf16.msra.mxu0 %v1556_v21  ;;  %922 = vmatprep.subr.bf16.mxu1 %v1561_v22  ;;  %v1644_v21 = vld [vmem:[#allocation7 + $0x20] sm:$0xff]   ;;  %v1645_v22 = vld [vmem:[#allocation7 + $0x68] sm:$0xff]  }
  0x87   :  { %1004 = vmatprep.subr.bf16.mxu0 %v1564_v23  ;;  %v1646_v23 = vld [vmem:[#allocation7 + $0x28] sm:$0xff]  }
  0x89   :  { %923 = vmatpush1.bf16.msra.mxu1 %v1559_v24  ;;  %v1647_v24 = vld [vmem:[#allocation7 + $0x70] sm:$0xff]  }
  0x8a   :  { %1005 = vmatpush1.bf16.msra.mxu0 %v1562_v25  ;;  %924 = vmatprep.subr.bf16.mxu1 %v1567_v26  ;;  %v1648_v25 = vld [vmem:[#allocation7 + $0x30] sm:$0xff]   ;;  %v1649_v26 = vld [vmem:[#allocation7 + $0x78] sm:$0xff]  }
  0x8b   :  { %1006 = vmatprep.subr.bf16.mxu0 %v1570_v27  ;;  %v1650_v27 = vld [vmem:[#allocation7 + $0x38] sm:$0xff]  }
  0x8d   :  { %925 = vmatpush1.bf16.msra.mxu1 %v1565_v28  ;;  %v195_v28 = vlaneseq }
  0x8e   :  { %1007 = vmatpush1.bf16.msra.mxu0 %v1568_v29  ;;  %926 = vmatprep.subr.bf16.mxu1 %v1573_v30 }
  0x8f   :  { %1008 = vmatprep.subr.bf16.mxu0 %v1576_v31  ;;  %v196_v29 = vshrl.u32 %v195_v28, 7  ;;  %v193_v31 = vld [vmem:[%s1855_s2] sm:$0x3] }
  0x91   :  { %927 = vmatpush1.bf16.msra.mxu1 %v1571_v32  ;;  %v197_v30 = vsub.s32 0, %v196_v29  ;;  %v201_v32 = vsub.s32 1, %v196_v29 }
  0x92   :  { %1009 = vmatpush1.bf16.msra.mxu0 %v1574_v35  ;;  %928 = vmatprep.subr.bf16.mxu1 %v1579_v38 }
  0x93   :  { %1010 = vmatprep.subr.bf16.mxu0 %v1582_v39  ;;  %v198_v33 = vrot.slane %v193_v31, %v197_v30  ;;  %v202_v34 = vrot.slane %v193_v31, %v201_v32 }
  0x95   :  { %929 = vmatpush1.bf16.msra.mxu1 %v1577_v40 }
  0x96   :  { %1011 = vmatpush1.bf16.msra.mxu0 %v1580_v41  ;;  %930 = vmatprep.subr.bf16.mxu1 %v1585_v42 }
  0x97   :  { %1012 = vmatprep.subr.bf16.mxu0 %v1588_v43 }
  0x99   :  { %931 = vmatpush1.bf16.msra.mxu1 %v1583_v44 }
  0x9a   :  { %1013 = vmatpush1.bf16.msra.mxu0 %v1586_v45  ;;  %932 = vmatprep.subr.bf16.mxu1 %v1591_v46 }
  0x9b   :  { %1014 = vmatprep.subr.bf16.mxu0 %v1594_v47 }
  0x9d   :  { %933 = vmatpush1.bf16.msra.mxu1 %v1589_v48 }
  0x9e   :  { %1015 = vmatpush1.bf16.msra.mxu0 %v1592_v49  ;;  %934 = vmatprep.subr.bf16.mxu1 %v1597_v50 }
  0x9f   :  { %1016 = vmatprep.subr.bf16.mxu0 %v1600_v51 }
  0xa1   :  { %935 = vmatpush1.bf16.msra.mxu1 %v1595_v52  ;;  %v1375_v52 = vld [vmem:[%s1857_s4] ss:$0 sm:$0xff] }
  0xa2   :  { %1017 = vmatpush1.bf16.msra.mxu0 %v1598_v53  ;;  %936 = vmatprep.subr.bf16.mxu1 %v1603_v54 }
  0xa3   :  { %1018 = vmatprep.subr.bf16.mxu0 %v1606_v55 }
  0xa5   :  { %937 = vmatpush1.bf16.msra.mxu1 %v1601_v56 }
  0xa6   :  { %1019 = vmatpush1.bf16.msra.mxu0 %v1604_v57  ;;  %938 = vmatprep.subr.bf16.mxu1 %v1609_v58 }
  0xa7   :  { %1020 = vmatprep.subr.bf16.mxu0 %v1612_v59 }
  0xa9   :  { %939 = vmatpush1.bf16.msra.mxu1 %v1607_v60 }
  0xaa   :  { %1021 = vmatpush1.bf16.msra.mxu0 %v1610_v61  ;;  %940 = vmatprep.subr.bf16.mxu1 %v1615_v62 }
  0xab   :  { %1022 = vmatprep.subr.bf16.mxu0 %v1618_v63 }
  0xad   :  { %941 = vmatpush1.bf16.msra.mxu1 %v1613_v0 }
  0xae   :  { %1023 = vmatpush1.bf16.msra.mxu0 %v1616_v1  ;;  %942 = vmatprep.subr.bf16.mxu1 %v1621_v2 }
  0xaf   :  { %1024 = vmatprep.subr.bf16.mxu0 %v1624_v3 }
  0xb1   :  { %943 = vmatpush1.bf16.msra.mxu1 %v1619_v4 }
  0xb2   :  { %1025 = vmatpush1.bf16.msra.mxu0 %v1622_v5  ;;  %944 = vmatprep.subr.bf16.mxu1 %v1627_v6 }
  0xb3   :  { %1026 = vmatprep.subr.bf16.mxu0 %v1630_v7 }
  0xb5   :  { %945 = vmatpush1.bf16.msra.mxu1 %v1625_v8 }
  0xb6   :  { %1027 = vmatpush1.bf16.msra.mxu0 %v1628_v9  ;;  %1393 = vmatprep.subr.bf16.mxu1 %v1635_v10 }
  0xb8   :  { %947 = vmatmul.mubr.bf16.vlgmr.msra.gmra.mrb[0].mxu1 %v1241_v11 }
  0xb9   :  { %1029 = vmatmul.mubr.bf16.vlgmr.msra.gmra.mrb[0].mxu0 %v1245_v12  ;;  %1394 = vmatpush3.bf16.msra.mxu1 %v1636_v13 }
  0xba   :  { %1395 = vmatprep.subr.bf16.mxu1 %v1637_v14 }
  0xbd   :  { %1396 = vmatpush3.bf16.msra.mxu1 %v1638_v15 }
  0xbe   :  { %1397 = vmatprep.subr.bf16.mxu1 %v1639_v16 }
  0xc1   :  { %1398 = vmatpush3.bf16.msra.mxu1 %v1640_v17 }
  0xc2   :  { %1399 = vmatprep.subr.bf16.mxu1 %v1641_v18 }
  0xc5   :  { %1400 = vmatpush3.bf16.msra.mxu1 %v1642_v19 }
  0xc6   :  { %1401 = vmatprep.subr.bf16.mxu1 %v1643_v20 }
  0xc9   :  { %1402 = vmatpush3.bf16.msra.mxu1 %v1644_v21 }
  0xca   :  { %1403 = vmatprep.subr.bf16.mxu1 %v1645_v22 }
  0xcd   :  { %1404 = vmatpush3.bf16.msra.mxu1 %v1646_v23 }
  0xce   :  { %1405 = vmatprep.subr.bf16.mxu1 %v1647_v24 }
  0xd1   :  { %1406 = vmatpush3.bf16.msra.mxu1 %v1648_v25 }
  0xd2   :  { %1407 = vmatprep.subr.bf16.mxu1 %v1649_v26 }
  0xd5   :  { %1408 = vmatpush3.bf16.msra.mxu1 %v1650_v27 }
 0x18b   :  { %v948_v35 = vpop.f32.mrb[0].mxu1 }
 0x18c   :  { %v1030_v36 = vpop.f32.mrb[0].mxu0  ;;  %v1415_v37 = vadd.f32 %v948_v35, %v198_v33  ;;  %v950_v38 = vpop.f32.mrb[1].mxu1 }
 0x18d   :  { %v1032_v39 = vpop.f32.mrb[1].mxu0  ;;  %v1417_v40 = vadd.f32 %v950_v38, %v202_v34  ;;  %v952_v41 = vpop.f32.mrb[2].mxu1 }
 0x18e   :  { %v1034_v42 = vpop.f32.mrb[2].mxu0  ;;  %v1416_v43 = vadd.f32 %v1415_v37, %v1030_v36  ;;  %v953_v44 = vpop.f32.mrb[3].mxu1 }
 0x18f   :  { %v1035_v45 = vpop.f32.mrb[3].mxu0  ;;  %v1418_v46 = vadd.f32 %v1417_v40, %v1032_v39 }
 0x190   :  { %v1037_v47 = vmax.f32 %v1416_v43, 0.0 }
 0x191   :  { %v1038_v48 = vmax.f32 %v1418_v46, 0.0 }
 0x192   :  { %v1039_v50 = vpack.c.bf16 %v1037_v47, %v1037_v47 }
 0x193   :  { %v1040_v49 = vpack.c.bf16 %v1038_v48, %v1038_v48 }
 0x195   :  { %1208 = vmatprep.mubr.bf16.mxu1 %v1040_v49 }
 0x196   :  { %1209 = vmatmul.mubr.bf16.vlgmr.msra.gmra.mrb[4].mxu1 %v1039_v50 }
 0x269   :  { %v1409_v51 = vpop.f32.mrb[4].mxu1 }
 0x26a   :  { %v1410_v53 = vpop.f32.mrb[5].mxu1 }
 0x26b   :  { %v1411_v54 = vadd.f32 %v1410_v53, %v1409_v51  ;;  %v1412_v55 = vpop.f32.mrb[6].mxu1 }
 0x26c   :  { %v1413_v56 = vpop.f32.mrb[7].mxu1 }
 0x26d   :  { %v1211_v57 = vadd.f32 %v1411_v54, %v1375_v52 }
 0x26f   :  { %v1392_v58 = vmul.f32 -1.442695, %v1211_v57 }
 0x271   :  { %1651 = vpow2.f32 %v1392_v58 }
 0x27b   :  { %v1652_v59 = vpop.eup %1651 }
 0x27c   :  { %v1219_v60 = vadd.f32 1.0, %v1652_v59 }
 0x27e   :  { %1653 = vrcp.f32 %v1219_v60 }
 0x288   :  { %v1654_v61 = vpop.eup %1653 }
 0x289   :  { %1222 = vst [vmem:[#allocation8] sm:$0xff] %v1654_v61 }
 0x28a   :  { %1732 = shalt.err (!%p1729_p0)
}
 0x28b   :  { %s1733_s12 = scalar_lea.hbm %s1858_s5, 128 }
 0x28c   :  { %p1734_p1 = scmp.ne.s32.totalorder %s1858_s5, %s1733_s12  ;;  %p1737_p2 = scmp.lt.u32.totalorder %s1733_s12, %s1858_s5 }
 0x28e   :  { %p1739_p3 = pnand %p1737_p2, %p1734_p1 }
 0x290   :  { %1742 = shalt.err (!%p1739_p3)
}
 0x291   :  { %1232 = dma.vmem_to_hbm [thread:$0]  %s1230_s9, 128, %s1858_s5, [#allocation4]  }
 0x292   :  { %1747 = dma.done.wait [#allocation4], 128  }
 0x293   :  { %1748 = vsyncadd [#allocation4], 4294967168 }
 0x294   :  { %1236 = vsyncpa [#allocation3], 1 }
 0x295   :  { %1237 = vsyncpa [#allocation6], 1 }
 0x296   :  { %1238 = vsyncpa [#allocation4], 1 }

</bundles_post_ra>
